<compile_context>
chip_gen: v7x
topology: tpu7x:2x2x1
jax: 0.10.0
libtpu: 0.0.40
codegen_flags: <defaults>
</compile_context>

<pallas_src>
import jax
import jax.numpy as jnp
from jax.experimental import pallas as pl
from jax.experimental.pallas import tpu as pltpu

INPUT_DIM = 24
H1 = 64
H2 = 16
OUTPUT_DIM = 4
LANE = 128
TILE_B_MAX = 8192  # lane-aligned batch tile; a few MiB of VMEM at most


def _cdiv(a, b):
    return (a + b - 1) // b


def _round_up(n, m):
    return _cdiv(n, m) * m


def motionnet_kernel(xt_ref, w1_ref, b1_ref, w2_ref, b2_ref, w3_ref, b3_ref, o_ref):
    """One batch tile: xt_ref is (24, tb) f32; weights are (out, in) bf16;
    biases are (out, 1) f32; o_ref is (4, tb) f32 (lane-dense)."""
    # In-kernel cast of the dominant stream (f32 in HBM -> bf16 MXU operand).
    xt = xt_ref[...].astype(jnp.bfloat16)

    # Linear(24 -> 64) + ReLU   (Dropout is identity in eval mode)
    h1 = jnp.dot(w1_ref[...], xt, preferred_element_type=jnp.float32) + b1_ref[...]
    h1 = jnp.maximum(h1, 0.0)

    # Linear(64 -> 16) + ReLU   (bf16 operands, f32 accumulation + elementwise)
    h2 = jnp.dot(w2_ref[...], h1.astype(jnp.bfloat16),
                 preferred_element_type=jnp.float32) + b2_ref[...]
    h2 = jnp.maximum(h2, 0.0)

    # Linear(16 -> 4)
    logits = jnp.dot(w3_ref[...], h2.astype(jnp.bfloat16),
                     preferred_element_type=jnp.float32) + b3_ref[...]

    # Numerically stable softmax over the 4-class sublane axis (axis 0).
    m = jnp.max(logits, axis=0, keepdims=True)
    e = jnp.exp(logits - m)
    probs = e / jnp.sum(e, axis=0, keepdims=True)  # exact division
    o_ref[...] = probs.astype(o_ref.dtype)


def motionnet_forward(x, params, tile_b_max=TILE_B_MAX, min_tiles=1):
    """x: (B, 24) float32, any B >= 1. Returns (B, 4) float32 probabilities.

    Set min_tiles=2 on v7x (2 TensorCores/chip) so the parallel batch grid has
    work for both cores even when B fits a single tile.
    """
    w1, b1, w2, b2, w3, b3 = params  # w: (out, in), b: (out, 1)
    B = x.shape[0]

    # Balanced, lane-aligned batch tiles: pad bounded by <LANE rows per tile.
    b_aligned = _round_up(B, LANE)
    n_tiles = max(_cdiv(b_aligned, tile_b_max), min_tiles)
    tb = _round_up(_cdiv(b_aligned, n_tiles), LANE)
    padded_B = n_tiles * tb

    # One layout transpose so batch sits on the lane axis inside the kernel.
    xt = x.astype(jnp.float32).T  # (24, B)
    if padded_B != B:
        xt = jnp.pad(xt, ((0, 0), (0, padded_B - B)))

    # Weights to bf16 once per call (tiny); biases stay f32.
    w1_bf = w1.astype(jnp.bfloat16)
    w2_bf = w2.astype(jnp.bfloat16)
    w3_bf = w3.astype(jnp.bfloat16)

    full = lambda shape: pl.BlockSpec(shape, lambda i: (0, 0))

    out_t = pl.pallas_call(
        motionnet_kernel,
        out_shape=jax.ShapeDtypeStruct((OUTPUT_DIM, padded_B), jnp.float32),
        grid_spec=pltpu.PrefetchScalarGridSpec(
            num_scalar_prefetch=0,
            grid=(n_tiles,),
            in_specs=[
                pl.BlockSpec((INPUT_DIM, tb), lambda i: (0, i)),  # x^T tile (f32)
                full((H1, INPUT_DIM)),    # w1 (bf16)
                full((H1, 1)),            # b1 (f32)
                full((H2, H1)),           # w2 (bf16)
                full((H2, 1)),            # b2 (f32)
                full((OUTPUT_DIM, H2)),   # w3 (bf16)
                full((OUTPUT_DIM, 1)),    # b3 (f32)
            ],
            out_specs=pl.BlockSpec((OUTPUT_DIM, tb), lambda i: (0, i)),
        ),
        compiler_params=pltpu.CompilerParams(
            dimension_semantics=("parallel",)  # batch grid shards across TCs
        ),
    )(xt, w1_bf, b1, w2_bf, b2, w3_bf, b3)

    # Back to the PyTorch-module layout (B, 4).
    return out_t[:, :B].T


def init_params(key):
    """Deterministic PyTorch-style init: w (out, in), b (out, 1), uniform(+-1/sqrt(fan_in))."""
    ks = jax.random.split(key, 6)

    def linear(kw, kb, fan_in, fan_out):
        bound = 1.0 / jnp.sqrt(fan_in)
        w = jax.random.uniform(kw, (fan_out, fan_in), jnp.float32, -bound, bound)
        b = jax.random.uniform(kb, (fan_out, 1), jnp.float32, -bound, bound)
        return w, b

    w1, b1 = linear(ks[0], ks[1], INPUT_DIM, H1)
    w2, b2 = linear(ks[2], ks[3], H1, H2)
    w3, b3 = linear(ks[4], ks[5], H2, OUTPUT_DIM)
    return (w1, b1, w2, b2, w3, b3)


def motionnet_ref(x, params):
    """Pure-JAX f32 reference (eval-mode forward), PyTorch (out, in) weights."""
    w1, b1, w2, b2, w3, b3 = params
    h1 = jnp.maximum(x @ w1.T + b1[:, 0], 0.0)
    h2 = jnp.maximum(h1 @ w2.T + b2[:, 0], 0.0)
    logits = h2 @ w3.T + b3[:, 0]
    return jax.nn.softmax(logits, axis=-1)


if __name__ == "__main__":
    key = jax.random.PRNGKey(0)
    kp, kx = jax.random.split(key)
    params = init_params(kp)

    B = 64  # not a multiple of the 128-lane tile; exercises the padding path
    x = jax.random.normal(kx, (B, INPUT_DIM), dtype=jnp.float32)

    out = motionnet_forward(x, params)
    out = jax.block_until_ready(out)

    ref = motionnet_ref(x, params)
    assert out.shape == (B, OUTPUT_DIM)
    # bf16 matmul operands => loose tolerance vs f32 reference.
    assert jnp.allclose(out, ref, atol=2e-2, rtol=2e-2)
    # Exact-division softmax: rows sum to 1 within f32 rounding.
    assert jnp.allclose(jnp.sum(out, axis=-1), jnp.ones((B,)), atol=1e-5)

    print("KERNEL_OK")
</pallas_src>

<mosaic_0001>
module attributes {stable_mosaic.version = 11 : i64} {
  func.func @motionnet_kernel(%arg0: i32, %arg1: memref<24x128xf32, #tpu.memory_space<vmem>>, %arg2: memref<64x24xbf16, #tpu.memory_space<vmem>>, %arg3: memref<64x1xf32, #tpu.memory_space<vmem>>, %arg4: memref<16x64xbf16, #tpu.memory_space<vmem>>, %arg5: memref<16x1xf32, #tpu.memory_space<vmem>>, %arg6: memref<4x16xbf16, #tpu.memory_space<vmem>>, %arg7: memref<4x1xf32, #tpu.memory_space<vmem>>, %arg8: memref<4x128xf32, #tpu.memory_space<vmem>>) attributes {dimension_semantics = [#tpu.dimension_semantics<parallel>], iteration_bounds = array<i64: 1>, scalar_prefetch = 0 : i64, scratch_operands = 0 : i64, tpu.core_type = #tpu.core_type<tc>, window_params = [{transform_indices = @transform_0, window_bounds = array<i64: 24, 128>}, {pipeline_mode = #tpu.pipeline_mode<synchronous>, transform_indices = @transform_1, window_bounds = array<i64: 64, 24>}, {pipeline_mode = #tpu.pipeline_mode<synchronous>, transform_indices = @transform_2, window_bounds = array<i64: 64, 1>}, {pipeline_mode = #tpu.pipeline_mode<synchronous>, transform_indices = @transform_3, window_bounds = array<i64: 16, 64>}, {pipeline_mode = #tpu.pipeline_mode<synchronous>, transform_indices = @transform_4, window_bounds = array<i64: 16, 1>}, {pipeline_mode = #tpu.pipeline_mode<synchronous>, transform_indices = @transform_5, window_bounds = array<i64: 4, 16>}, {pipeline_mode = #tpu.pipeline_mode<synchronous>, transform_indices = @transform_6, window_bounds = array<i64: 4, 1>}, {transform_indices = @transform_7, window_bounds = array<i64: 4, 128>}]} {
    %c0 = arith.constant 0 : index
    %c0_0 = arith.constant 0 : index
    %0 = vector.load %arg1[%c0, %c0_0] : memref<24x128xf32, #tpu.memory_space<vmem>>, vector<24x128xf32>
    %1 = arith.truncf %0 : vector<24x128xf32> to vector<24x128xbf16>
    %c0_1 = arith.constant 0 : index
    %c0_2 = arith.constant 0 : index
    %2 = vector.load %arg2[%c0_1, %c0_2] : memref<64x24xbf16, #tpu.memory_space<vmem>>, vector<64x24xbf16>
    %cst = arith.constant dense<0.000000e+00> : vector<64x128xf32>
    %3 = tpu.matmul %2, %1, %cst {dimension_numbers = #tpu.dot_dimension_numbers<[1], [0], [0], [1], [0, 0, 1, 1], [], []>} : vector<64x24xbf16>, vector<24x128xbf16>, vector<64x128xf32> -> vector<64x128xf32>
    %c0_3 = arith.constant 0 : index
    %c0_4 = arith.constant 0 : index
    %4 = vector.load %arg3[%c0_3, %c0_4] : memref<64x1xf32, #tpu.memory_space<vmem>>, vector<64x1xf32>
    %5 = vector.broadcast %4 : vector<64x1xf32> to vector<64x128xf32>
    %6 = arith.addf %3, %5 : vector<64x128xf32>
    %cst_5 = arith.constant 0.000000e+00 : f32
    %7 = vector.broadcast %cst_5 : f32 to vector<64x128xf32>
    %8 = arith.maximumf %6, %7 : vector<64x128xf32>
    %c0_6 = arith.constant 0 : index
    %c0_7 = arith.constant 0 : index
    %9 = vector.load %arg4[%c0_6, %c0_7] : memref<16x64xbf16, #tpu.memory_space<vmem>>, vector<16x64xbf16>
    %10 = arith.truncf %8 : vector<64x128xf32> to vector<64x128xbf16>
    %cst_8 = arith.constant dense<0.000000e+00> : vector<16x128xf32>
    %11 = tpu.matmul %9, %10, %cst_8 {dimension_numbers = #tpu.dot_dimension_numbers<[1], [0], [0], [1], [0, 0, 1, 1], [], []>} : vector<16x64xbf16>, vector<64x128xbf16>, vector<16x128xf32> -> vector<16x128xf32>
    %c0_9 = arith.constant 0 : index
    %c0_10 = arith.constant 0 : index
    %12 = vector.load %arg5[%c0_9, %c0_10] : memref<16x1xf32, #tpu.memory_space<vmem>>, vector<16x1xf32>
    %13 = vector.broadcast %12 : vector<16x1xf32> to vector<16x128xf32>
    %14 = arith.addf %11, %13 : vector<16x128xf32>
    %cst_11 = arith.constant 0.000000e+00 : f32
    %15 = vector.broadcast %cst_11 : f32 to vector<16x128xf32>
    %16 = arith.maximumf %14, %15 : vector<16x128xf32>
    %c0_12 = arith.constant 0 : index
    %c0_13 = arith.constant 0 : index
    %17 = vector.load %arg6[%c0_12, %c0_13] : memref<4x16xbf16, #tpu.memory_space<vmem>>, vector<4x16xbf16>
    %18 = arith.truncf %16 : vector<16x128xf32> to vector<16x128xbf16>
    %cst_14 = arith.constant dense<0.000000e+00> : vector<4x128xf32>
    %19 = tpu.matmul %17, %18, %cst_14 {dimension_numbers = #tpu.dot_dimension_numbers<[1], [0], [0], [1], [0, 0, 1, 1], [], []>} : vector<4x16xbf16>, vector<16x128xbf16>, vector<4x128xf32> -> vector<4x128xf32>
    %c0_15 = arith.constant 0 : index
    %c0_16 = arith.constant 0 : index
    %20 = vector.load %arg7[%c0_15, %c0_16] : memref<4x1xf32, #tpu.memory_space<vmem>>, vector<4x1xf32>
    %21 = vector.broadcast %20 : vector<4x1xf32> to vector<4x128xf32>
    %22 = arith.addf %19, %21 : vector<4x128xf32>
    %cst_17 = arith.constant dense<0xFF800000> : vector<128xf32>
    %23 = vector.multi_reduction <maximumf>, %22, %cst_17 [0] : vector<4x128xf32> to vector<128xf32>
    %24 = vector.shape_cast %23 : vector<128xf32> to vector<1x128xf32>
    %25 = vector.broadcast %24 : vector<1x128xf32> to vector<4x128xf32>
    %26 = arith.subf %22, %25 : vector<4x128xf32>
    %27 = math.exp %26 : vector<4x128xf32>
    %cst_18 = arith.constant dense<0.000000e+00> : vector<128xf32>
    %28 = vector.multi_reduction <add>, %27, %cst_18 [0] : vector<4x128xf32> to vector<128xf32>
    %29 = vector.shape_cast %28 : vector<128xf32> to vector<1x128xf32>
    %30 = vector.broadcast %29 : vector<1x128xf32> to vector<4x128xf32>
    %31 = arith.divf %27, %30 : vector<4x128xf32>
    %c0_19 = arith.constant 0 : index
    %c0_20 = arith.constant 0 : index
    %32 = vector.load %arg8[%c0_19, %c0_20] : memref<4x128xf32, #tpu.memory_space<vmem>>, vector<4x128xf32>
    tpu.vector_store %arg8[%c0_19, %c0_20], %31 {strides = array<i32>} : memref<4x128xf32, #tpu.memory_space<vmem>>, vector<4x128xf32>,
    return
  }
  func.func @transform_0(%arg0: i32) -> (i32, i32) {
    %c0_i32 = arith.constant 0 : i32
    %c0_i32_0 = arith.constant 0 : i32
    return %c0_i32, %arg0 : i32, i32
  }
  func.func @transform_1(%arg0: i32) -> (i32, i32) {
    %c0_i32 = arith.constant 0 : i32
    %c0_i32_0 = arith.constant 0 : i32
    %c0_i32_1 = arith.constant 0 : i32
    return %c0_i32, %c0_i32_0 : i32, i32
  }
  func.func @transform_2(%arg0: i32) -> (i32, i32) {
    %c0_i32 = arith.constant 0 : i32
    %c0_i32_0 = arith.constant 0 : i32
    %c0_i32_1 = arith.constant 0 : i32
    return %c0_i32, %c0_i32_0 : i32, i32
  }
  func.func @transform_3(%arg0: i32) -> (i32, i32) {
    %c0_i32 = arith.constant 0 : i32
    %c0_i32_0 = arith.constant 0 : i32
    %c0_i32_1 = arith.constant 0 : i32
    return %c0_i32, %c0_i32_0 : i32, i32
  }
  func.func @transform_4(%arg0: i32) -> (i32, i32) {
    %c0_i32 = arith.constant 0 : i32
    %c0_i32_0 = arith.constant 0 : i32
    %c0_i32_1 = arith.constant 0 : i32
    return %c0_i32, %c0_i32_0 : i32, i32
  }
  func.func @transform_5(%arg0: i32) -> (i32, i32) {
    %c0_i32 = arith.constant 0 : i32
    %c0_i32_0 = arith.constant 0 : i32
    %c0_i32_1 = arith.constant 0 : i32
    return %c0_i32, %c0_i32_0 : i32, i32
  }
  func.func @transform_6(%arg0: i32) -> (i32, i32) {
    %c0_i32 = arith.constant 0 : i32
    %c0_i32_0 = arith.constant 0 : i32
    %c0_i32_1 = arith.constant 0 : i32
    return %c0_i32, %c0_i32_0 : i32, i32
  }
  func.func @transform_7(%arg0: i32) -> (i32, i32) {
    %c0_i32 = arith.constant 0 : i32
    %c0_i32_0 = arith.constant 0 : i32
    return %c0_i32, %arg0 : i32, i32
  }
}

</mosaic_0001>

<bundles_post_ra>
// kernel: tpu_custom_call.1
= control target key start
LH: loop header
LB: loop body
LE: loop exit
PB: predicated region body
PF: predicated region fallthrough
CT: control target
= control target key end

     0   :  { %vm109_vm0 = vcmask 195584   ;;  %v449_v6 = vmov 0   ;;  %vm122_vm1 = vcmask 1043456   ;;  %s573_s0 = inlined_call_operand.vmem [shape: f32[24,128], index: 0, kind: input, shape index: {}]   ;;  %s574_s1 = inlined_call_operand.vmem [shape: bf16[64,24], index: 1, kind: input, shape index: {}]   ;;  %s575_s2 = inlined_call_operand.vmem [shape: f32[64,1], index: 2, kind: input, shape index: {}]   ;;  %s576_s3 = inlined_call_operand.vmem [shape: bf16[16,64], index: 3, kind: input, shape index: {}]   ;;  %s577_s4 = inlined_call_operand.vmem [shape: f32[16,1], index: 4, kind: input, shape index: {}]   ;;  %s578_s5 = inlined_call_operand.vmem [shape: bf16[4,16], index: 5, kind: input, shape index: {}]   ;;  %s579_s6 = inlined_call_operand.vmem [shape: f32[4,1], index: 6, kind: input, shape index: {}]   ;;  %s580_s7 = inlined_call_operand.hbm [shape: f32[4,128], index: 7, kind: output, shape index: {}]  }
   0x1   :  { %v28_v0 = vld [vmem:[%s573_s0] sm:$0xff]  ;;  %v29_v1 = vld [vmem:[%s573_s0 + $0x8] sm:$0xff]  ;;  %v30_v2 = vld [vmem:[%s573_s0 + $0x10] sm:$0xff]  ;;  %414 = vset.pattern.permute.xlu0 %v449_v6  ;;  %415 = vset.pattern.permute.xlu1 %v449_v6 }
   0x2   :  { %v31_v3 = vpack.c.bf16 %v29_v1, %v28_v0  ;;  %v32_v4 = vpack.c.bf16 %v30_v2, %v30_v2  ;;  %v416_v5 = vld [vmem:[%s574_s1] sm:$0xff]   ;;  %v43_v9 = vld [vmem:[%s575_s2 + $0x10] sm:$0xff]  ;;  %v417_v10 = vld [vmem:[%s574_s1 + $0x8] sm:$0xff]  }
   0x3   :  { %383 = vmatprep.mubr.msk.bf16.mxu0 %vm109_vm0, %v416_v5  ;;  %v41_v8 = vld [vmem:[%s575_s2] sm:$0xff]  ;;  %61 = vperm.xlu1 %415, %v43_v9   ;;  %v42_v11 = vld [vmem:[%s575_s2 + $0x8] sm:$0xff]  ;;  %v44_v12 = vld [vmem:[%s575_s2 + $0x18] sm:$0xff] }
   0x4   :  { %379 = vmatprep.subr.bf16.mxu0 %v31_v3  ;;  %v124_v7 = vsel %vm122_vm1, %v32_v4, 0  ;;  %51 = vperm.xlu0 %414, %v41_v8   ;;  %v418_v13 = vld [vmem:[%s574_s1 + $0x10] sm:$0xff]  }
   0x5   :  { %380 = vmatpush3.bf16.msra.mxu0 %v31_v3 }
   0x6   :  { %409 = vmatprep.subr.msk.bf16.mxu0 %vm122_vm1, %v32_v4 }
   0x9   :  { %382 = vmatpush3.bf16.msra.mxu0 %v124_v7 }
   0xa   :  { %12 = vsyncpa [#allocation3], 0  ;;  %56 = vperm.xlu0 %414, %v42_v11   ;;  %66 = vperm.xlu1 %415, %v44_v12   ;;  %v45_v14 = vld [vmem:[%s575_s2 + $0x20] sm:$0xff]  ;;  %v46_v15 = vld [vmem:[%s575_s2 + $0x28] sm:$0xff]  ;;  %v450_v22 = vmov 0.0   ;;  %vm451_vm2 = vmmov 0  }
   0xb   :  { %v419_v16 = vld [vmem:[%s574_s1 + $0x18] sm:$0xff]   ;;  %v47_v17 = vld [vmem:[%s575_s2 + $0x30] sm:$0xff]  ;;  %v205_v19 = vld [vmem:[%s577_s4] sm:$0xff]  ;;  %391 = vmatprep.subr.bf16.mxu1 %v450_v22  ;;  %403 = vmatprep.subr.bf16.mxu0 %v450_v22  ;;  %vm222_vm3 = vcmask 523264   ;;  %vm277_vm4 = vcmask 130048  }
   0xc   :  { %384 = vmatmul.mubr.msk.bf16.vlgmr.msra.gmra.mrb[0].mxu0 %vm109_vm0, %v417_v10  ;;  %v48_v18 = vld [vmem:[%s575_s2 + $0x38] sm:$0xff]  ;;  %v206_v20 = vld [vmem:[%s577_s4 + $0x8] sm:$0xff]  ;;  %v271_v21 = vld [vmem:[%s579_s6] sm:$0xf]  ;;  %399 = vmatprep.mubr.msk.bf16.mxu1 %vm451_vm2, %v450_v22 }
   0xd   :  { %387 = vmatprep.mubr.msk.bf16.mxu0 %vm109_vm0, %v418_v13  ;;  %v420_v59 = vld [vmem:[%s576_s3] sm:$0xff]   ;;  %s452_s3 = smov [#allocation2]  }
   0xe   :  { %71 = vperm.xlu0 %414, %v45_v14   ;;  %76 = vperm.xlu1 %415, %v46_v15   ;;  %v269_v7 = vld [vmem:[%s578_s5] sm:$0x3]  ;;  %s347_s5 = sshll.u32 %s452_s3, 4  ;;  %s348_s5 = int_to_ptr.vmem [resolvable:$true] %s347_s5 }
   0xf   :  { %s425_s12 = scalar_lea.vmem %s348_s5, 64  ;;  %p430_p1 = scmp.lt.s32.totalorder %s348_s5, %s348_s5 }
  0x10   :  { %p426_p0 = scmp.ne.s32.totalorder %s348_s5, %s425_s12  ;;  %p431_p2 = scmp.lt.s32.totalorder %s425_s12, %s425_s12 }
  0x12   :  { %81 = vperm.xlu0 %414, %v47_v17   ;;  %86 = vperm.xlu1 %415, %v48_v18   ;;  %p432_p3 = por %p431_p2, %p430_p1 }
  0x14   :  { %388 = vmatmul.mubr.msk.bf16.gmra.mrb[4].mxu0 %vm109_vm0, %v419_v16  ;;  %p433_p4 = pnand %p432_p3, %p426_p0 }
  0x15   :  { %405 = vmatprep.mubr.msk.bf16.mxu0 %vm451_vm2, %v450_v22 }
  0x16   :  { %209 = vperm.xlu0 %414, %v205_v19   ;;  %214 = vperm.xlu1 %415, %v206_v20  }
  0x1a   :  { %274 = vperm.xlu0 %414, %v271_v21  }
  0x82   :  { %v62_v24 = vpop.permute.xlu1 %61 }
  0x83   :  { %v52_v23 = vpop.permute.xlu0 %51 }
  0x89   :  { %v57_v25 = vpop.permute.xlu0 %56  ;;  %v67_v26 = vpop.permute.xlu1 %66 }
  0x8d   :  { %v72_v30 = vpop.permute.xlu0 %71  ;;  %v77_v35 = vpop.permute.xlu1 %76 }
  0x91   :  { %v82_v42 = vpop.permute.xlu0 %81  ;;  %v87_v47 = vpop.permute.xlu1 %86 }
  0x95   :  { %v210_v60 = vpop.permute.xlu0 %209  ;;  %v215_v0 = vpop.permute.xlu1 %214 }
  0x99   :  { %v275_v8 = vpop.permute.xlu0 %274 }
  0xdf   :  { %v385_v27 = vpop.f32.mrb[0].mxu0 }
  0xe0   :  { %v169_v28 = vadd.f32 %v385_v27, %v62_v24  ;;  %v160_v29 = vpop.f32.mrb[1].mxu0 }
  0xe1   :  { %v161_v31 = vadd.f32 %v160_v29, %v52_v23  ;;  %v386_v32 = vpop.f32.mrb[2].mxu0 }
  0xe2   :  { %v172_v33 = vadd.f32 %v386_v32, %v67_v26  ;;  %v163_v34 = vpop.f32.mrb[3].mxu0  ;;  %v193_v37 = vmax.f32 %v169_v28, 0.0 }
  0xe3   :  { %v164_v36 = vadd.f32 %v163_v34, %v57_v25  ;;  %v191_v39 = vmax.f32 %v161_v31, 0.0 }
  0xe4   :  { %v194_v38 = vmax.f32 %v172_v33, 0.0 }
  0xe5   :  { %v192_v40 = vmax.f32 %v164_v36, 0.0 }
  0xe6   :  { %v202_v41 = vpack.c.bf16 %v194_v38, %v193_v37 }
  0xe7   :  { %v389_v43 = vpop.f32.mrb[4].mxu0  ;;  %v201_v44 = vpack.c.bf16 %v192_v40, %v191_v39 }
  0xe8   :  { %v185_v45 = vadd.f32 %v389_v43, %v82_v42  ;;  %v176_v46 = vpop.f32.mrb[5].mxu0 }
  0xe9   :  { %v177_v48 = vadd.f32 %v176_v46, %v72_v30  ;;  %v390_v49 = vpop.f32.mrb[6].mxu0  ;;  %392 = vmatpush3.bf16.msra.mxu1 %v201_v44 }
  0xea   :  { %v188_v50 = vadd.f32 %v390_v49, %v87_v47  ;;  %v179_v51 = vpop.f32.mrb[7].mxu0  ;;  %393 = vmatprep.subr.bf16.mxu1 %v450_v22  ;;  %v197_v53 = vmax.f32 %v185_v45, 0.0 }
  0xeb   :  { %v180_v52 = vadd.f32 %v179_v51, %v77_v35  ;;  %v195_v55 = vmax.f32 %v177_v48, 0.0 }
  0xec   :  { %v198_v54 = vmax.f32 %v188_v50, 0.0 }
  0xed   :  { %v196_v56 = vmax.f32 %v180_v52, 0.0  ;;  %394 = vmatpush3.bf16.msra.mxu1 %v202_v41 }
  0xee   :  { %v204_v57 = vpack.c.bf16 %v198_v54, %v197_v53  ;;  %395 = vmatprep.subr.bf16.mxu1 %v450_v22 }
  0xef   :  { %v203_v58 = vpack.c.bf16 %v196_v56, %v195_v55 }
  0xf1   :  { %396 = vmatpush3.bf16.msra.mxu1 %v203_v58 }
  0xf2   :  { %397 = vmatprep.subr.bf16.mxu1 %v450_v22 }
  0xf5   :  { %398 = vmatpush3.bf16.msra.mxu1 %v204_v57 }
  0xf8   :  { %400 = vmatmul.mubr.msk.bf16.vlgmr.msra.gmra.mrb[0].mxu1 %vm222_vm3, %v420_v59 }
 0x1cb   :  { %v260_v61 = vpop.f32.mrb[0].mxu1 }
 0x1cc   :  { %v261_v62 = vadd.f32 %v260_v61, %v210_v60  ;;  %v401_v63 = vpop.f32.mrb[1].mxu1 }
 0x1cd   :  { %v263_v1 = vpop.f32.mrb[2].mxu1 }
 0x1ce   :  { %v264_v2 = vadd.f32 %v263_v1, %v215_v0  ;;  %v402_v3 = vpop.f32.mrb[3].mxu1  ;;  %v267_v4 = vmax.f32 %v261_v62, 0.0 }
 0x1d0   :  { %v268_v5 = vmax.f32 %v264_v2, 0.0 }
 0x1d2   :  { %v270_v6 = vpack.c.bf16 %v268_v5, %v267_v4 }
 0x1d4   :  { %404 = vmatpush3.bf16.msra.mxu0 %v270_v6 }
 0x1d7   :  { %406 = vmatmul.mubr.msk.bf16.vlgmr.msra.gmra.mrb[8].mxu0 %vm277_vm4, %v269_v7 }
 0x2aa   :  { %v315_v9 = vpop.f32.mrb[8].mxu0 }
 0x2ab   :  { %v316_v10 = vadd.f32 %v315_v9, %v275_v8  ;;  %v407_v11 = vpop.f32.mrb[9].mxu0 }
 0x2ac   :  { %v318_v12 = vpop.f32.mrb[10].mxu0 }
 0x2ad   :  { %v321_v13 = vsel %vm122_vm1, %v316_v10, -inf  ;;  %v408_v14 = vpop.f32.mrb[11].mxu0 }
 0x2ae   :  { %v322_v15 = vrot.slane %v321_v13, 4 }
 0x2b0   :  { %v323_v16 = vmax.f32 %v321_v13, %v322_v15 }
 0x2b2   :  { %v324_v17 = vrot.slane %v323_v16, 2 }
 0x2b4   :  { %v325_v18 = vmax.f32 %v323_v16, %v324_v17 }
 0x2b6   :  { %v326_v19 = vrot.slane %v325_v18, 1 }
 0x2b8   :  { %v327_v20 = vmax.f32 %v325_v18, %v326_v19 }
 0x2ba   :  { %v328_v21 = vsub.f32 %v316_v10, %v327_v20 }
 0x2bc   :  { %v329_v22 = vmul.f32 1.442695, %v328_v21 }
 0x2be   :  { %421 = vpow2.f32 %v329_v22 }
 0x2c8   :  { %v422_v23 = vpop.eup %421 }
 0x2c9   :  { %v331_v24 = vsel %vm122_vm1, %v422_v23, 0.0 }
 0x2ca   :  { %v332_v25 = vrot.slane %v331_v24, 4 }
 0x2cc   :  { %v333_v26 = vadd.f32 %v332_v25, %v331_v24 }
 0x2ce   :  { %v334_v27 = vrot.slane %v333_v26, 2 }
 0x2d0   :  { %v335_v28 = vadd.f32 %v334_v27, %v333_v26 }
 0x2d2   :  { %v336_v29 = vrot.slane %v335_v28, 1 }
 0x2d4   :  { %v337_v30 = vadd.f32 %v336_v29, %v335_v28 }
 0x2d6   :  { %423 = vrcp.f32 %v337_v30 }
 0x2e0   :  { %v424_v31 = vpop.eup %423 }
 0x2e1   :  { %v339_v32 = vmul.f32 %v424_v31, %v422_v23 }
 0x2e3   :  { %340 = vst [vmem:[#allocation2] sm:$0xf] %v339_v32 }
 0x2e4   :  { %436 = shalt.err (!%p433_p4)
}
 0x2e5   :  { %s437_s15 = scalar_lea.hbm %s580_s7, 64 }
 0x2e6   :  { %p438_p5 = scmp.ne.s32.totalorder %s580_s7, %s437_s15  ;;  %p441_p6 = scmp.lt.u32.totalorder %s437_s15, %s580_s7 }
 0x2e8   :  { %p443_p7 = pnand %p441_p6, %p438_p5 }
 0x2ea   :  { %446 = shalt.err (!%p443_p7)
}
 0x2eb   :  { %350 = dma.vmem_to_hbm [thread:$0]  %s348_s5, 64, %s580_s7, [#allocation3]  }
 0x2ec   :  { %447 = dma.done.wait [#allocation3], 64  }
 0x2ed   :  { %448 = vsyncadd [#allocation3], 4294967232 }
 0x2ee   :  { %354 = vsyncpa [#allocation3], 1 }

</bundles_post_ra>
